<compile_context>
chip_gen: v7x
topology: tpu7x:2x2x1
jax: 0.10.0
libtpu: 0.0.40
codegen_flags: <defaults>
</compile_context>

<pallas_src>
import functools

import jax
import jax.numpy as jnp
from jax.experimental import pallas as pl
from jax.experimental.pallas import tpu as pltpu

_EPS = 1e-6
_LANES = 128
_TM_MAX = 1024  # max rows per tile (512 KiB per f32 input tile)


def _round_up(a, b):
    return ((a + b - 1) // b) * b


def _cdiv(a, b):
    return (a + b - 1) // b


def _sublane_multiple(dtype) -> int:
    # f32 -> 8, bf16 -> 16, int8/fp8 -> 32 sublane packing.
    return max(8, 32 // jnp.dtype(dtype).itemsize)


def _dice_partial_kernel(x_ref, y_ref, out_ref, *, tm, k_per_p, rows, needs_mask):
    p = pl.program_id(0)   # partition (parallel axis; v7x megacore split)
    k = pl.program_id(1)   # tile within partition (reduction axis)

    @pl.when(k == 0)
    def _init():
        out_ref[...] = jnp.zeros_like(out_ref)

    x = x_ref[...].astype(jnp.float32)
    y = y_ref[...].astype(jnp.float32)

    if needs_mask:
        tile_idx = p * k_per_p + k               # unclamped logical tile index
        row0 = tile_idx * tm
        row_ids = jax.lax.broadcasted_iota(jnp.int32, (tm, _LANES), 0)
        valid = (row0 + row_ids) < rows
        x = jnp.where(valid, x, 0.0)
        y = jnp.where(valid, y, 0.0)

    # Per-tile partial sums folded down to one (8, 128) vreg: pure VPU adds.
    xy = (x * y).reshape(tm // 8, 8, _LANES).sum(axis=0)
    sq = (x * x + y * y).reshape(tm // 8, 8, _LANES).sum(axis=0)

    out_ref[0, 0] += xy   # intersection partials
    out_ref[0, 1] += sq   # ||x||^2 + ||y||^2 partials


def dice_loss(x, y, offset=1.0, eps=_EPS):
    """offset - dice_coefficient(x, y); returns a float32 scalar."""
    xf = jnp.ravel(x)
    yf = jnp.ravel(y)
    n = xf.shape[0]

    # Zero-pad only if needed to reach a whole 128-lane row (exact for the sums).
    pad = (-n) % _LANES
    if pad:
        xf = jnp.pad(xf, (0, pad))
        yf = jnp.pad(yf, (0, pad))
    rows = (n + pad) // _LANES
    x2d = xf.reshape(rows, _LANES)
    y2d = yf.reshape(rows, _LANES)

    sub = max(_sublane_multiple(x2d.dtype), _sublane_multiple(y2d.dtype))
    tm = min(_TM_MAX, _round_up(rows, sub))
    num_tiles = _cdiv(rows, tm)
    num_parts = 2 if num_tiles >= 2 else 1        # split across v7x's 2 TCs
    k_per_p = _cdiv(num_tiles, num_parts)
    needs_clamp = num_parts * k_per_p != num_tiles
    needs_mask = num_parts * k_per_p * tm != rows

    def in_map(p, k):
        t = p * k_per_p + k
        if needs_clamp:
            t = jnp.minimum(t, num_tiles - 1)     # duplicate is fully masked in-kernel
        return (t, 0)

    kernel = functools.partial(
        _dice_partial_kernel,
        tm=tm, k_per_p=k_per_p, rows=rows, needs_mask=needs_mask)

    partials = pl.pallas_call(
        kernel,
        out_shape=jax.ShapeDtypeStruct((num_parts, 2, 8, _LANES), jnp.float32),
        grid_spec=pltpu.PrefetchScalarGridSpec(
            num_scalar_prefetch=0,
            grid=(num_parts, k_per_p),
            in_specs=[
                pl.BlockSpec((tm, _LANES), in_map),   # x tile
                pl.BlockSpec((tm, _LANES), in_map),   # y tile
            ],
            out_specs=pl.BlockSpec((1, 2, 8, _LANES), lambda p, k: (p, 0, 0, 0)),
        ),
        compiler_params=pltpu.CompilerParams(
            dimension_semantics=("parallel", "arbitrary"),
        ),
    )(x2d, y2d)

    # Tiny final combine (num_parts x 2 x 8 x 128 floats) + offset / eps clamp.
    intersection = jnp.sum(partials[:, 0])
    union = jnp.maximum(jnp.sum(partials[:, 1]), eps)   # .clamp(min=eps)
    coefficient = 2.0 * intersection / union
    return jnp.asarray(offset, jnp.float32) - coefficient


if __name__ == "__main__":
    key = jax.random.PRNGKey(0)

    def reference(x, y, offset=1.0):
        inter = jnp.sum(x * y)
        union = jnp.maximum(jnp.sum(x * x) + jnp.sum(y * y), _EPS)
        return offset - 2.0 * inter / union

    # Small NCHW-like prediction / target, consistent with a segmentation head.
    kx, ky = jax.random.split(key)
    x = jax.nn.sigmoid(jax.random.normal(kx, (2, 4, 16, 16), dtype=jnp.float32))
    y = (jax.random.uniform(ky, (2, 4, 16, 16)) > 0.5).astype(jnp.float32)
    loss = dice_loss(x, y, offset=1.0)
    jax.block_until_ready(loss)
    ref = reference(x, y)
    assert jnp.allclose(loss, ref, rtol=1e-5, atol=1e-6), (loss, ref)

    # Second shape exercising the tail-mask and 2-partition (v7x split) paths.
    kx2, ky2 = jax.random.split(ky)
    x2 = jax.nn.sigmoid(jax.random.normal(kx2, (4, 8, 72, 64), dtype=jnp.float32))
    y2 = (jax.random.uniform(ky2, (4, 8, 72, 64)) > 0.5).astype(jnp.float32)
    loss2 = dice_loss(x2, y2, offset=1.0)
    jax.block_until_ready(loss2)
    ref2 = reference(x2, y2)
    assert jnp.allclose(loss2, ref2, rtol=1e-4, atol=1e-5), (loss2, ref2)

    print("KERNEL_OK")
</pallas_src>

<mosaic_0001>
module attributes {stable_mosaic.version = 11 : i64} {
  func.func @_dice_partial_kernel(%arg0: i32, %arg1: i32, %arg2: memref<16x128xf32, #tpu.memory_space<vmem>>, %arg3: memref<16x128xf32, #tpu.memory_space<vmem>>, %arg4: memref<1x2x8x128xf32, #tpu.memory_space<vmem>>) attributes {dimension_semantics = [#tpu.dimension_semantics<parallel>, #tpu.dimension_semantics<arbitrary>], iteration_bounds = array<i64: 1, 1>, scalar_prefetch = 0 : i64, scratch_operands = 0 : i64, tpu.core_type = #tpu.core_type<tc>, window_params = [{transform_indices = @transform_0, window_bounds = array<i64: 16, 128>}, {transform_indices = @transform_1, window_bounds = array<i64: 16, 128>}, {transform_indices = @transform_2, window_bounds = array<i64: 1, 2, 8, 128>}]} {
    %c0_i32 = arith.constant 0 : i32
    %0 = arith.cmpi eq, %arg1, %c0_i32 : i32
    %1 = arith.extui %0 : i1 to i32
    %c0_i32_0 = arith.constant 0 : i32
    %2 = arith.cmpi ne, %1, %c0_i32_0 : i32
    scf.if %2 {
      %cst_20 = arith.constant 0.000000e+00 : f32
      %25 = vector.broadcast %cst_20 : f32 to vector<1x2x8x128xf32>
      %c0_21 = arith.constant 0 : index
      %c0_22 = arith.constant 0 : index
      %c0_23 = arith.constant 0 : index
      %c0_24 = arith.constant 0 : index
      %26 = vector.load %arg4[%c0_21, %c0_22, %c0_23, %c0_24] : memref<1x2x8x128xf32, #tpu.memory_space<vmem>>, vector<1x2x8x128xf32>
      tpu.vector_store %arg4[%c0_21, %c0_22, %c0_23, %c0_24], %25 {strides = array<i32>} : memref<1x2x8x128xf32, #tpu.memory_space<vmem>>, vector<1x2x8x128xf32>,
    } else {
    }
    %c0 = arith.constant 0 : index
    %c0_1 = arith.constant 0 : index
    %3 = vector.load %arg2[%c0, %c0_1] : memref<16x128xf32, #tpu.memory_space<vmem>>, vector<16x128xf32>
    %c0_2 = arith.constant 0 : index
    %c0_3 = arith.constant 0 : index
    %4 = vector.load %arg3[%c0_2, %c0_3] : memref<16x128xf32, #tpu.memory_space<vmem>>, vector<16x128xf32>
    %5 = arith.mulf %3, %4 : vector<16x128xf32>
    %6 = vector.shape_cast %5 : vector<16x128xf32> to vector<2x8x128xf32>
    %cst = arith.constant dense<0.000000e+00> : vector<8x128xf32>
    %7 = vector.multi_reduction <add>, %6, %cst [0] : vector<2x8x128xf32> to vector<8x128xf32>
    %8 = arith.mulf %3, %3 : vector<16x128xf32>
    %9 = arith.mulf %4, %4 : vector<16x128xf32>
    %10 = arith.addf %8, %9 : vector<16x128xf32>
    %11 = vector.shape_cast %10 : vector<16x128xf32> to vector<2x8x128xf32>
    %cst_4 = arith.constant dense<0.000000e+00> : vector<8x128xf32>
    %12 = vector.multi_reduction <add>, %11, %cst_4 [0] : vector<2x8x128xf32> to vector<8x128xf32>
    %c0_5 = arith.constant 0 : index
    %c0_6 = arith.constant 0 : index
    %c0_7 = arith.constant 0 : index
    %c0_8 = arith.constant 0 : index
    %13 = vector.load %arg4[%c0_5, %c0_6, %c0_7, %c0_8] : memref<1x2x8x128xf32, #tpu.memory_space<vmem>>, vector<1x1x8x128xf32>
    %14 = vector.shape_cast %13 : vector<1x1x8x128xf32> to vector<8x128xf32>
    %15 = arith.addf %14, %7 : vector<8x128xf32>
    %c0_9 = arith.constant 0 : index
    %c0_10 = arith.constant 0 : index
    %c0_11 = arith.constant 0 : index
    %c0_12 = arith.constant 0 : index
    %16 = vector.load %arg4[%c0_9, %c0_10, %c0_11, %c0_12] : memref<1x2x8x128xf32, #tpu.memory_space<vmem>>, vector<1x1x8x128xf32>
    %17 = vector.shape_cast %16 : vector<1x1x8x128xf32> to vector<8x128xf32>
    %18 = vector.shape_cast %15 : vector<8x128xf32> to vector<1x1x8x128xf32>
    tpu.vector_store %arg4[%c0_9, %c0_10, %c0_11, %c0_12], %18 {strides = array<i32>} : memref<1x2x8x128xf32, #tpu.memory_space<vmem>>, vector<1x1x8x128xf32>,
    %c0_13 = arith.constant 0 : index
    %c1 = arith.constant 1 : index
    %c0_14 = arith.constant 0 : index
    %c0_15 = arith.constant 0 : index
    %19 = vector.load %arg4[%c0_13, %c1, %c0_14, %c0_15] : memref<1x2x8x128xf32, #tpu.memory_space<vmem>>, vector<1x1x8x128xf32>
    %20 = vector.shape_cast %19 : vector<1x1x8x128xf32> to vector<8x128xf32>
    %21 = arith.addf %20, %12 : vector<8x128xf32>
    %c0_16 = arith.constant 0 : index
    %c1_17 = arith.constant 1 : index
    %c0_18 = arith.constant 0 : index
    %c0_19 = arith.constant 0 : index
    %22 = vector.load %arg4[%c0_16, %c1_17, %c0_18, %c0_19] : memref<1x2x8x128xf32, #tpu.memory_space<vmem>>, vector<1x1x8x128xf32>
    %23 = vector.shape_cast %22 : vector<1x1x8x128xf32> to vector<8x128xf32>
    %24 = vector.shape_cast %21 : vector<8x128xf32> to vector<1x1x8x128xf32>
    tpu.vector_store %arg4[%c0_16, %c1_17, %c0_18, %c0_19], %24 {strides = array<i32>} : memref<1x2x8x128xf32, #tpu.memory_space<vmem>>, vector<1x1x8x128xf32>,
    return
  }
  func.func @transform_0(%arg0: i32, %arg1: i32) -> (i32, i32) {
    %c1_i32 = arith.constant 1 : i32
    %0 = arith.muli %arg0, %c1_i32 : i32
    %1 = arith.addi %0, %arg1 : i32
    %c0_i32 = arith.constant 0 : i32
    %c0_i32_0 = arith.constant 0 : i32
    return %1, %c0_i32 : i32, i32
  }
  func.func @transform_1(%arg0: i32, %arg1: i32) -> (i32, i32) {
    %c1_i32 = arith.constant 1 : i32
    %0 = arith.muli %arg0, %c1_i32 : i32
    %1 = arith.addi %0, %arg1 : i32
    %c0_i32 = arith.constant 0 : i32
    %c0_i32_0 = arith.constant 0 : i32
    return %1, %c0_i32 : i32, i32
  }
  func.func @transform_2(%arg0: i32, %arg1: i32) -> (i32, i32, i32, i32) {
    %c0_i32 = arith.constant 0 : i32
    %c0_i32_0 = arith.constant 0 : i32
    %c0_i32_1 = arith.constant 0 : i32
    %c0_i32_2 = arith.constant 0 : i32
    return %arg0, %c0_i32, %c0_i32_0, %c0_i32_1 : i32, i32, i32, i32
  }
}

</mosaic_0001>

<bundles_post_ra>
// kernel: tpu_custom_call.1
= control target key start
LH: loop header
LB: loop body
LE: loop exit
PB: predicated region body
PF: predicated region fallthrough
CT: control target
= control target key end

     0   :  { %7 = vsyncpa [#allocation3], 0  ;;  %s240_s0 = inlined_call_operand.hbm [shape: f32[16,128], index: 0, kind: input, shape index: {}]   ;;  %s241_s1 = inlined_call_operand.hbm [shape: f32[16,128], index: 1, kind: input, shape index: {}]   ;;  %s242_s2 = inlined_call_operand.hbm [shape: f32[1,2,8,128], index: 2, kind: output, shape index: {}]  }
   0x1   :  { %8 = vsyncpa [#allocation6], 0 }
   0x2   :  { %9 = vsyncpa [#allocation4], 0  ;;  %s175_s9 = smov [#allocation2]   ;;  %s103_s13 = scalar_lea.hbm %s240_s0, 256 }
   0x3   :  { %s19_s10 = sshll.u32 %s175_s9, 4  ;;  %p104_p0 = scmp.ne.s32.totalorder %s240_s0, %s103_s13  ;;  %s20_s10 = int_to_ptr.vmem [resolvable:$true] %s19_s10 }
   0x4   :  { %p107_p1 = scmp.lt.u32.totalorder %s103_s13, %s240_s0 }
   0x6   :  { %p109_p2 = pnand %p107_p1, %p104_p0 }
   0x8   :  { %112 = shalt.err (!%p109_p2)
}
   0x9   :  { %s113_s18 = scalar_lea.vmem %s20_s10, 256  ;;  %p118_p4 = scmp.lt.s32.totalorder %s20_s10, %s20_s10 }
   0xa   :  { %p114_p3 = scmp.ne.s32.totalorder %s20_s10, %s113_s18  ;;  %p119_p5 = scmp.lt.s32.totalorder %s113_s18, %s113_s18 }
   0xc   :  { %p120_p6 = por %p119_p5, %p118_p4 }
   0xe   :  { %p121_p7 = pnand %p120_p6, %p114_p3 }
  0x10   :  { %124 = shalt.err (!%p121_p7)
}
  0x11   :  { %s176_s19 = smov 128   ;;  %s177_s20 = smov 8  }
  0x12   :  { %25 = dma.hbm_to_vmem [thread:$0]  %s240_s0, 256, %s20_s10, [#allocation3], %s176_s19, %s176_s19, %s177_s20  }
  0x13   :  { %s178_s23 = smov [#allocation5]   ;;  %s125_s27 = scalar_lea.hbm %s241_s1, 256 }
  0x14   :  { %s35_s24 = sshll.u32 %s178_s23, 4  ;;  %p126_p8 = scmp.ne.s32.totalorder %s241_s1, %s125_s27  ;;  %s36_s24 = int_to_ptr.vmem [resolvable:$true] %s35_s24 }
  0x15   :  { %p129_p9 = scmp.lt.u32.totalorder %s125_s27, %s241_s1 }
  0x17   :  { %p131_p10 = pnand %p129_p9, %p126_p8 }
  0x19   :  { %134 = shalt.err (!%p131_p10)
}
  0x1a   :  { %s135_s4 = scalar_lea.vmem %s36_s24, 256  ;;  %p140_p12 = scmp.lt.s32.totalorder %s36_s24, %s36_s24 }
  0x1b   :  { %p136_p11 = scmp.ne.s32.totalorder %s36_s24, %s135_s4  ;;  %p141_p13 = scmp.lt.s32.totalorder %s135_s4, %s135_s4 }
  0x1d   :  { %p142_p0 = por %p141_p13, %p140_p12 }
  0x1f   :  { %p143_p1 = pnand %p142_p0, %p136_p11 }
  0x21   :  { %146 = shalt.err (!%p143_p1)
}
  0x22   :  { %41 = dma.hbm_to_vmem [thread:$0]  %s241_s1, 256, %s36_s24, [#allocation6], %s176_s19, %s176_s19, %s177_s20  }
  0x23   :  { %169 = dma.done.wait [#allocation3], 256  }
  0x24   :  { %170 = vsyncadd [#allocation3], 4294967040 }
  0x25   :  { %171 = dma.done.wait [#allocation6], 256  }
  0x26   :  { %172 = vsyncadd [#allocation6], 4294967040  ;;  %v58_v0 = vld [vmem:[#allocation2] sm:$0xff]  ;;  %v59_v1 = vld [vmem:[#allocation2 + $0x8] sm:$0xff]  ;;  %s179_s6 = smov [#allocation7]  }
  0x27   :  { %v60_v2 = vld [vmem:[#allocation5] sm:$0xff]  ;;  %v61_v3 = vld [vmem:[#allocation5 + $0x8] sm:$0xff]  ;;  %v65_v5 = vmul.f32 %v58_v0, %v58_v0  ;;  %v66_v6 = vmul.f32 %v59_v1, %v59_v1  ;;  %s84_s7 = sshll.u32 %s179_s6, 4  ;;  %s85_s7 = int_to_ptr.vmem [resolvable:$true] %s84_s7 }
  0x28   :  { %v62_v4 = vmul.f32 %v60_v2, %v58_v0  ;;  %v67_v7 = vmul.f32 %v60_v2, %v60_v2  ;;  %v63_v8 = vmul.f32 %v61_v3, %v59_v1  ;;  %v68_v9 = vmul.f32 %v61_v3, %v61_v3  ;;  %s147_s1 = scalar_lea.vmem %s85_s7, 256  ;;  %p152_p3 = scmp.lt.s32.totalorder %s85_s7, %s85_s7 }
  0x29   :  { %p148_p2 = scmp.ne.s32.totalorder %s85_s7, %s147_s1  ;;  %p153_p4 = scmp.lt.s32.totalorder %s147_s1, %s147_s1 }
  0x2a   :  { %v69_v10 = vadd.f32 %v67_v7, %v65_v5  ;;  %v64_v11 = vadd.f32 %v63_v8, %v62_v4  ;;  %v70_v12 = vadd.f32 %v68_v9, %v66_v6 }
  0x2b   :  { %p154_p5 = por %p153_p4, %p152_p3 }
  0x2c   :  { %v71_v13 = vadd.f32 %v70_v12, %v69_v10  ;;  %74 = vst [vmem:[#allocation7] sm:$0xff] %v64_v11 }
  0x2d   :  { %p155_p6 = pnand %p154_p5, %p148_p2 }
  0x2e   :  { %78 = vst [vmem:[#allocation7 + $0x8] sm:$0xff] %v71_v13 }
  0x2f   :  { %158 = shalt.err (!%p155_p6)
}
  0x30   :  { %s159_s10 = scalar_lea.hbm %s242_s2, 256 }
  0x31   :  { %p160_p7 = scmp.ne.s32.totalorder %s242_s2, %s159_s10  ;;  %p163_p8 = scmp.lt.u32.totalorder %s159_s10, %s242_s2 }
  0x33   :  { %p165_p9 = pnand %p163_p8, %p160_p7 }
  0x35   :  { %168 = shalt.err (!%p165_p9)
}
  0x36   :  { %90 = dma.vmem_to_hbm [thread:$0]  %s85_s7, 256, %s242_s2, [#allocation4], %s176_s19, %s176_s19, %s177_s20  }
  0x37   :  { %173 = dma.done.wait [#allocation4], 256  }
  0x38   :  { %174 = vsyncadd [#allocation4], 4294967040 }
  0x39   :  { %94 = vsyncpa [#allocation3], 1 }
  0x3a   :  { %95 = vsyncpa [#allocation6], 1 }
  0x3b   :  { %96 = vsyncpa [#allocation4], 1 }

</bundles_post_ra>
